<compile_context>
chip_gen: v7x
topology: tpu7x:2x2x1
jax: 0.10.0
libtpu: 0.0.40
codegen_flags: <defaults>
</compile_context>

<pallas_src>
import functools

import jax
import jax.numpy as jnp
from jax import lax
from jax.experimental import pallas as pl
from jax.experimental.pallas import tpu as pltpu


def bert_embeddings_kernel(
    ids_ref,      # SMEM  [B, S] int32   (scalar prefetch)
    tts_ref,      # SMEM  [B, S] int32   (scalar prefetch)
    word_hbm,     # HBM   [V, H]         (pl.ANY, gathered manually)
    tt_hbm,       # HBM   [T, H]         (pl.ANY, gathered manually)
    pos_ref,      # VMEM  [seq_tile, H]  (auto-pipelined slice of pos table)
    gamma_ref,    # VMEM  [1, H]
    beta_ref,     # VMEM  [1, H]
    out_ref,      # VMEM  [1, seq_tile, H]
    wbuf,         # VMEM scratch [seq_tile, H]  word-embedding gather buffer
    tbuf,         # VMEM scratch [seq_tile, H]  token-type gather buffer
    sems,         # DMA semaphores (2, seq_tile)
    *,
    seq_tile,
    eps,
):
    b = pl.program_id(0)
    s_blk = pl.program_id(1)
    s0 = s_blk * seq_tile

    # Phase 1: issue one row-gather DMA per token for word + token-type tables.
    @pl.loop(0, seq_tile)
    def _(t):
        tok = ids_ref[b, s0 + t]
        tt = tts_ref[b, s0 + t]
        pltpu.make_async_copy(
            word_hbm.at[pl.ds(tok, 1)], wbuf.at[pl.ds(t, 1)], sems.at[0, t]
        ).start()
        pltpu.make_async_copy(
            tt_hbm.at[pl.ds(tt, 1)], tbuf.at[pl.ds(t, 1)], sems.at[1, t]
        ).start()

    # Phase 2: wait for all gathers of this tile.
    @pl.loop(0, seq_tile)
    def _(t):
        pltpu.make_async_copy(
            word_hbm.at[pl.ds(0, 1)], wbuf.at[pl.ds(t, 1)], sems.at[0, t]
        ).wait()
        pltpu.make_async_copy(
            tt_hbm.at[pl.ds(0, 1)], tbuf.at[pl.ds(t, 1)], sems.at[1, t]
        ).wait()

    # Sum the three embeddings in f32 and apply LayerNorm over H.
    x = (
        wbuf[...].astype(jnp.float32)
        + tbuf[...].astype(jnp.float32)
        + pos_ref[...].astype(jnp.float32)
    )
    mean = jnp.mean(x, axis=-1, keepdims=True)
    centered = x - mean
    var = jnp.mean(centered * centered, axis=-1, keepdims=True)
    inv = lax.rsqrt(var + eps)
    y = centered * inv * gamma_ref[...].astype(jnp.float32) + beta_ref[...].astype(
        jnp.float32
    )

    out_ref[0, :, :] = y.astype(out_ref.dtype)


def bert_embeddings(
    input_ids,          # [B, S] int
    word_table,         # [vocab_size, H]
    pos_table,          # [max_position_embeddings, H]
    tt_table,           # [type_vocab_size, H]
    gamma,              # [H]
    beta,               # [H]
    token_type_ids=None,  # [B, S] int or None (defaults to zeros, as in PyTorch)
    *,
    eps=1e-12,
    seq_tile=None,
):
    B, S = input_ids.shape
    V, H = word_table.shape
    P = pos_table.shape[0]
    assert P >= S, "seq_len exceeds max_position_embeddings"

    if token_type_ids is None:
        token_type_ids = jnp.zeros((B, S), dtype=jnp.int32)
    input_ids = input_ids.astype(jnp.int32)
    token_type_ids = token_type_ids.astype(jnp.int32)

    if seq_tile is None:
        seq_tile = next((t for t in (128, 64, 32, 16, 8) if S % t == 0), S)
    assert S % seq_tile == 0, "seq_len must be divisible by seq_tile (pad seq)"
    assert seq_tile % 8 == 0 or (seq_tile == S == P), (
        "seq_tile must be a multiple of 8 sublanes (or equal the full extent)"
    )

    gamma2d = gamma.reshape(1, H)
    beta2d = beta.reshape(1, H)

    grid = (B, S // seq_tile)
    kernel = functools.partial(bert_embeddings_kernel, seq_tile=seq_tile, eps=eps)

    return pl.pallas_call(
        kernel,
        out_shape=jax.ShapeDtypeStruct((B, S, H), word_table.dtype),
        grid_spec=pltpu.PrefetchScalarGridSpec(
            num_scalar_prefetch=2,
            grid=grid,
            in_specs=[
                pl.BlockSpec(memory_space=pl.ANY),   # word table stays in HBM
                pl.BlockSpec(memory_space=pl.ANY),   # token-type table stays in HBM
                # default arange position ids -> contiguous slice of pos table
                pl.BlockSpec((seq_tile, H), lambda b, s, ids, tts: (s, 0)),
                pl.BlockSpec((1, H), lambda b, s, ids, tts: (0, 0)),   # gamma
                pl.BlockSpec((1, H), lambda b, s, ids, tts: (0, 0)),   # beta
            ],
            out_specs=pl.BlockSpec(
                (1, seq_tile, H), lambda b, s, ids, tts: (b, s, 0)
            ),
            scratch_shapes=[
                pltpu.VMEM((seq_tile, H), word_table.dtype),
                pltpu.VMEM((seq_tile, H), tt_table.dtype),
                pltpu.SemaphoreType.DMA((2, seq_tile)),
            ],
        ),
        compiler_params=pltpu.CompilerParams(
            dimension_semantics=("parallel", "parallel"),
        ),
    )(input_ids, token_type_ids, word_table, tt_table, pos_table, gamma2d, beta2d)


if __name__ == "__main__":
    # Small shapes consistent with BertEmbeddings: batch=2, seq=8, hidden=32
    B, S, H = 2, 8, 32
    V, P, T = 100, 16, 2   # vocab_size, max_position_embeddings, type_vocab_size
    eps = 1e-12

    key = jax.random.PRNGKey(0)
    k1, k2, k3, k4, k5, k6, k7 = jax.random.split(key, 7)

    word_table = jax.random.normal(k1, (V, H), dtype=jnp.float32) * 0.02
    pos_table = jax.random.normal(k2, (P, H), dtype=jnp.float32) * 0.02
    tt_table = jax.random.normal(k3, (T, H), dtype=jnp.float32) * 0.02
    gamma = 1.0 + 0.1 * jax.random.normal(k4, (H,), dtype=jnp.float32)
    beta = 0.1 * jax.random.normal(k5, (H,), dtype=jnp.float32)

    input_ids = jax.random.randint(k6, (B, S), 0, V, dtype=jnp.int32)
    token_type_ids = jax.random.randint(k7, (B, S), 0, T, dtype=jnp.int32)

    out = bert_embeddings(
        input_ids, word_table, pos_table, tt_table, gamma, beta, token_type_ids,
        eps=eps,
    )
    out = jax.block_until_ready(out)

    # Reference in plain JAX (same semantics as the PyTorch eval forward).
    emb = (
        word_table[input_ids]
        + pos_table[jnp.arange(S)][None, :, :]
        + tt_table[token_type_ids]
    )
    mean = emb.mean(-1, keepdims=True)
    var = ((emb - mean) ** 2).mean(-1, keepdims=True)
    ref = (emb - mean) / jnp.sqrt(var + eps) * gamma + beta

    assert out.shape == (B, S, H)
    assert jnp.allclose(out, ref, atol=1e-5, rtol=1e-5)

    print("KERNEL_OK")
</pallas_src>

<mosaic_0001>
module attributes {stable_mosaic.version = 11 : i64} {
  func.func @bert_embeddings_kernel(%arg0: i32, %arg1: i32, %arg2: memref<2x8xi32, #tpu.memory_space<smem>>, %arg3: memref<2x8xi32, #tpu.memory_space<smem>>, %arg4: memref<100x32xf32, #tpu.memory_space<any>>, %arg5: memref<2x32xf32, #tpu.memory_space<any>>, %arg6: memref<8x32xf32, #tpu.memory_space<vmem>>, %arg7: memref<1x32xf32, #tpu.memory_space<vmem>>, %arg8: memref<1x32xf32, #tpu.memory_space<vmem>>, %arg9: memref<1x8x32xf32, #tpu.memory_space<vmem>>, %arg10: memref<8x32xf32, #tpu.memory_space<vmem>>, %arg11: memref<8x32xf32, #tpu.memory_space<vmem>>, %arg12: memref<2x8x!tpu.dma_semaphore, #tpu.memory_space<semaphore_mem>>) attributes {dimension_semantics = [#tpu.dimension_semantics<parallel>, #tpu.dimension_semantics<parallel>], iteration_bounds = array<i64: 2, 1>, scalar_prefetch = 2 : i64, scratch_operands = 3 : i64, tpu.core_type = #tpu.core_type<tc>, window_params = [{}, {}, {transform_indices = @transform_2, window_bounds = array<i64: 8, 32>}, {pipeline_mode = #tpu.pipeline_mode<synchronous>, transform_indices = @transform_3, window_bounds = array<i64: 1, 32>}, {pipeline_mode = #tpu.pipeline_mode<synchronous>, transform_indices = @transform_4, window_bounds = array<i64: 1, 32>}, {transform_indices = @transform_5, window_bounds = array<i64: 1, 8, 32>}]} {
    %c8_i32 = arith.constant 8 : i32
    %0 = arith.muli %arg1, %c8_i32 : i32
    %c0_i32 = arith.constant 0 : i32
    %c8_i32_0 = arith.constant 8 : i32
    %1 = arith.addi %c0_i32, %c8_i32_0 : i32
    %c1_i32 = arith.constant 1 : i32
    scf.for %arg13 = %c0_i32 to %1 step %c1_i32  : i32 {
      %c1_i32_22 = arith.constant 1 : i32
      %33 = arith.muli %arg13, %c1_i32_22 : i32
      %c0_i32_23 = arith.constant 0 : i32
      %34 = arith.addi %c0_i32_23, %33 : i32
      %35 = arith.addi %0, %34 : i32
      %36 = arith.index_cast %arg0 : i32 to index
      %37 = arith.index_cast %35 : i32 to index
      %38 = memref.load %arg2[%36, %37] : memref<2x8xi32, #tpu.memory_space<smem>>
      %39 = arith.addi %0, %34 : i32
      %40 = arith.index_cast %arg0 : i32 to index
      %41 = arith.index_cast %39 : i32 to index
      %42 = memref.load %arg3[%40, %41] : memref<2x8xi32, #tpu.memory_space<smem>>
      %c0_i32_24 = arith.constant 0 : i32
      %c0_i32_25 = arith.constant 0 : i32
      %43 = tpu.memref_slice %arg4[%38, %c0_i32_25] : memref<100x32xf32, #tpu.memory_space<any>> -> memref<1x32xf32, #tpu.memory_space<any>>
      %c0_i32_26 = arith.constant 0 : i32
      %44 = tpu.memref_slice %arg10[%34, %c0_i32_26] : memref<8x32xf32, #tpu.memory_space<vmem>> -> memref<1x32xf32, #tpu.memory_space<vmem>>
      %45 = tpu.memref_slice %arg12[%c0_i32_24, %34] : memref<2x8x!tpu.dma_semaphore, #tpu.memory_space<semaphore_mem>> -> memref<1x1x!tpu.dma_semaphore, #tpu.memory_space<semaphore_mem>>
      %46 = tpu.memref_squeeze %45 : memref<1x1x!tpu.dma_semaphore, #tpu.memory_space<semaphore_mem>> -> memref<!tpu.dma_semaphore, #tpu.memory_space<semaphore_mem>>
      tpu.enqueue_dma source(%43 : memref<1x32xf32, #tpu.memory_space<any>>) target(%44 : memref<1x32xf32, #tpu.memory_space<vmem>>) target_semaphore(%46 : memref<!tpu.dma_semaphore, #tpu.memory_space<semaphore_mem>>)
      %c1_i32_27 = arith.constant 1 : i32
      %c0_i32_28 = arith.constant 0 : i32
      %47 = tpu.memref_slice %arg5[%42, %c0_i32_28] : memref<2x32xf32, #tpu.memory_space<any>> -> memref<1x32xf32, #tpu.memory_space<any>>
      %c0_i32_29 = arith.constant 0 : i32
      %48 = tpu.memref_slice %arg11[%34, %c0_i32_29] : memref<8x32xf32, #tpu.memory_space<vmem>> -> memref<1x32xf32, #tpu.memory_space<vmem>>
      %49 = tpu.memref_slice %arg12[%c1_i32_27, %34] : memref<2x8x!tpu.dma_semaphore, #tpu.memory_space<semaphore_mem>> -> memref<1x1x!tpu.dma_semaphore, #tpu.memory_space<semaphore_mem>>
      %50 = tpu.memref_squeeze %49 : memref<1x1x!tpu.dma_semaphore, #tpu.memory_space<semaphore_mem>> -> memref<!tpu.dma_semaphore, #tpu.memory_space<semaphore_mem>>
      tpu.enqueue_dma source(%47 : memref<1x32xf32, #tpu.memory_space<any>>) target(%48 : memref<1x32xf32, #tpu.memory_space<vmem>>) target_semaphore(%50 : memref<!tpu.dma_semaphore, #tpu.memory_space<semaphore_mem>>)
    }
    %c8_i32_1 = arith.constant 8 : i32
    %c0_i32_2 = arith.constant 0 : i32
    %c8_i32_3 = arith.constant 8 : i32
    %2 = arith.addi %c0_i32_2, %c8_i32_3 : i32
    %c1_i32_4 = arith.constant 1 : i32
    scf.for %arg13 = %c0_i32_2 to %2 step %c1_i32_4  : i32 {
      %c1_i32_22 = arith.constant 1 : i32
      %33 = arith.muli %arg13, %c1_i32_22 : i32
      %c0_i32_23 = arith.constant 0 : i32
      %34 = arith.addi %c0_i32_23, %33 : i32
      %c0_i32_24 = arith.constant 0 : i32
      %c0_i32_25 = arith.constant 0 : i32
      %c0_i32_26 = arith.constant 0 : i32
      %35 = tpu.memref_slice %arg4[%c0_i32_25, %c0_i32_26] : memref<100x32xf32, #tpu.memory_space<any>> -> memref<1x32xf32, #tpu.memory_space<any>>
      %c0_i32_27 = arith.constant 0 : i32
      %36 = tpu.memref_slice %arg10[%34, %c0_i32_27] : memref<8x32xf32, #tpu.memory_space<vmem>> -> memref<1x32xf32, #tpu.memory_space<vmem>>
      %37 = tpu.memref_slice %arg12[%c0_i32_24, %34] : memref<2x8x!tpu.dma_semaphore, #tpu.memory_space<semaphore_mem>> -> memref<1x1x!tpu.dma_semaphore, #tpu.memory_space<semaphore_mem>>
      %38 = tpu.memref_squeeze %37 : memref<1x1x!tpu.dma_semaphore, #tpu.memory_space<semaphore_mem>> -> memref<!tpu.dma_semaphore, #tpu.memory_space<semaphore_mem>>
      tpu.wait_dma2 semaphore(%38 : memref<!tpu.dma_semaphore, #tpu.memory_space<semaphore_mem>>) src(%35 : memref<1x32xf32, #tpu.memory_space<any>>) dst(%36 : memref<1x32xf32, #tpu.memory_space<vmem>>)
      %c1_i32_28 = arith.constant 1 : i32
      %c0_i32_29 = arith.constant 0 : i32
      %c0_i32_30 = arith.constant 0 : i32
      %39 = tpu.memref_slice %arg5[%c0_i32_29, %c0_i32_30] : memref<2x32xf32, #tpu.memory_space<any>> -> memref<1x32xf32, #tpu.memory_space<any>>
      %c0_i32_31 = arith.constant 0 : i32
      %40 = tpu.memref_slice %arg11[%34, %c0_i32_31] : memref<8x32xf32, #tpu.memory_space<vmem>> -> memref<1x32xf32, #tpu.memory_space<vmem>>
      %41 = tpu.memref_slice %arg12[%c1_i32_28, %34] : memref<2x8x!tpu.dma_semaphore, #tpu.memory_space<semaphore_mem>> -> memref<1x1x!tpu.dma_semaphore, #tpu.memory_space<semaphore_mem>>
      %42 = tpu.memref_squeeze %41 : memref<1x1x!tpu.dma_semaphore, #tpu.memory_space<semaphore_mem>> -> memref<!tpu.dma_semaphore, #tpu.memory_space<semaphore_mem>>
      tpu.wait_dma2 semaphore(%42 : memref<!tpu.dma_semaphore, #tpu.memory_space<semaphore_mem>>) src(%39 : memref<1x32xf32, #tpu.memory_space<any>>) dst(%40 : memref<1x32xf32, #tpu.memory_space<vmem>>)
    }
    %c8_i32_5 = arith.constant 8 : i32
    %c0 = arith.constant 0 : index
    %c0_6 = arith.constant 0 : index
    %3 = vector.load %arg10[%c0, %c0_6] : memref<8x32xf32, #tpu.memory_space<vmem>>, vector<8x32xf32>
    %c0_7 = arith.constant 0 : index
    %c0_8 = arith.constant 0 : index
    %4 = vector.load %arg11[%c0_7, %c0_8] : memref<8x32xf32, #tpu.memory_space<vmem>>, vector<8x32xf32>
    %5 = arith.addf %3, %4 : vector<8x32xf32>
    %c0_9 = arith.constant 0 : index
    %c0_10 = arith.constant 0 : index
    %6 = vector.load %arg6[%c0_9, %c0_10] : memref<8x32xf32, #tpu.memory_space<vmem>>, vector<8x32xf32>
    %7 = arith.addf %5, %6 : vector<8x32xf32>
    %cst = arith.constant dense<0.000000e+00> : vector<8xf32>
    %8 = vector.multi_reduction <add>, %7, %cst [1] : vector<8x32xf32> to vector<8xf32>
    %9 = vector.shape_cast %8 : vector<8xf32> to vector<8x1xf32>
    %cst_11 = arith.constant 3.200000e+01 : f32
    %10 = vector.broadcast %cst_11 : f32 to vector<8x1xf32>
    %11 = arith.divf %9, %10 : vector<8x1xf32>
    %12 = vector.broadcast %11 : vector<8x1xf32> to vector<8x32xf32>
    %13 = arith.subf %7, %12 : vector<8x32xf32>
    %14 = arith.mulf %13, %13 : vector<8x32xf32>
    %cst_12 = arith.constant dense<0.000000e+00> : vector<8xf32>
    %15 = vector.multi_reduction <add>, %14, %cst_12 [1] : vector<8x32xf32> to vector<8xf32>
    %16 = vector.shape_cast %15 : vector<8xf32> to vector<8x1xf32>
    %cst_13 = arith.constant 3.200000e+01 : f32
    %17 = vector.broadcast %cst_13 : f32 to vector<8x1xf32>
    %18 = arith.divf %16, %17 : vector<8x1xf32>
    %cst_14 = arith.constant 9.99999996E-13 : f32
    %19 = vector.broadcast %cst_14 : f32 to vector<8x1xf32>
    %20 = arith.addf %18, %19 : vector<8x1xf32>
    %21 = math.rsqrt %20 : vector<8x1xf32>
    %22 = vector.broadcast %21 : vector<8x1xf32> to vector<8x32xf32>
    %23 = arith.mulf %13, %22 : vector<8x32xf32>
    %c0_15 = arith.constant 0 : index
    %c0_16 = arith.constant 0 : index
    %24 = vector.load %arg7[%c0_15, %c0_16] : memref<1x32xf32, #tpu.memory_space<vmem>>, vector<1x32xf32>
    %25 = vector.broadcast %24 : vector<1x32xf32> to vector<8x32xf32>
    %26 = arith.mulf %23, %25 : vector<8x32xf32>
    %c0_17 = arith.constant 0 : index
    %c0_18 = arith.constant 0 : index
    %27 = vector.load %arg8[%c0_17, %c0_18] : memref<1x32xf32, #tpu.memory_space<vmem>>, vector<1x32xf32>
    %28 = vector.broadcast %27 : vector<1x32xf32> to vector<8x32xf32>
    %29 = arith.addf %26, %28 : vector<8x32xf32>
    %c0_19 = arith.constant 0 : index
    %c0_20 = arith.constant 0 : index
    %c0_21 = arith.constant 0 : index
    %30 = vector.load %arg9[%c0_19, %c0_20, %c0_21] : memref<1x8x32xf32, #tpu.memory_space<vmem>>, vector<1x8x32xf32>
    %31 = vector.shape_cast %30 : vector<1x8x32xf32> to vector<8x32xf32>
    %32 = vector.shape_cast %29 : vector<8x32xf32> to vector<1x8x32xf32>
    tpu.vector_store %arg9[%c0_19, %c0_20, %c0_21], %32 {strides = array<i32>} : memref<1x8x32xf32, #tpu.memory_space<vmem>>, vector<1x8x32xf32>,
    return
  }
  func.func @transform_2(%arg0: i32, %arg1: i32, %arg2: memref<2x8xi32, #tpu.memory_space<smem>>, %arg3: memref<2x8xi32, #tpu.memory_space<smem>>) -> (i32, i32) {
    %c0_i32 = arith.constant 0 : i32
    %c0_i32_0 = arith.constant 0 : i32
    return %arg1, %c0_i32 : i32, i32
  }
  func.func @transform_3(%arg0: i32, %arg1: i32, %arg2: memref<2x8xi32, #tpu.memory_space<smem>>, %arg3: memref<2x8xi32, #tpu.memory_space<smem>>) -> (i32, i32) {
    %c0_i32 = arith.constant 0 : i32
    %c0_i32_0 = arith.constant 0 : i32
    %c0_i32_1 = arith.constant 0 : i32
    return %c0_i32, %c0_i32_0 : i32, i32
  }
  func.func @transform_4(%arg0: i32, %arg1: i32, %arg2: memref<2x8xi32, #tpu.memory_space<smem>>, %arg3: memref<2x8xi32, #tpu.memory_space<smem>>) -> (i32, i32) {
    %c0_i32 = arith.constant 0 : i32
    %c0_i32_0 = arith.constant 0 : i32
    %c0_i32_1 = arith.constant 0 : i32
    return %c0_i32, %c0_i32_0 : i32, i32
  }
  func.func @transform_5(%arg0: i32, %arg1: i32, %arg2: memref<2x8xi32, #tpu.memory_space<smem>>, %arg3: memref<2x8xi32, #tpu.memory_space<smem>>) -> (i32, i32, i32) {
    %c0_i32 = arith.constant 0 : i32
    %c0_i32_0 = arith.constant 0 : i32
    return %arg0, %arg1, %c0_i32 : i32, i32, i32
  }
}

</mosaic_0001>

<bundles_post_ra>
// kernel: tpu_custom_call.1
= control target key start
LH: loop header
LB: loop body
LE: loop exit
PB: predicated region body
PF: predicated region fallthrough
CT: control target
= control target key end

     0   :  { %s1010_s0 = inlined_call_operand.vmem [shape: s32[2,8], index: 0, kind: input, shape index: {}]   ;;  %s1011_s2 = inlined_call_operand.vmem [shape: f32[100,32], index: 2, kind: input, shape index: {}]   ;;  %s1012_s3 = inlined_call_operand.vmem [shape: f32[2,32], index: 3, kind: input, shape index: {}]   ;;  %s1013_s4 = inlined_call_operand.vmem [shape: f32[16,32], index: 4, kind: input, shape index: {}]   ;;  %s1014_s5 = inlined_call_operand.vmem [shape: f32[1,32], index: 5, kind: input, shape index: {}]   ;;  %s1015_s6 = inlined_call_operand.vmem [shape: f32[1,32], index: 6, kind: input, shape index: {}]   ;;  %s1016_s7 = inlined_call_operand.hbm [shape: f32[2,8,32], index: 7, kind: output, shape index: {}]   ;;  %s1017_s1 = inlined_call_operand.vmem [shape: s32[2,8], index: 1, kind: input, shape index: {}]  }
   0x1   :  { %s12_s26 = sshll.u32 %s1010_s0, 4  ;;  %s16_s29 = sshll.u32 %s1017_s1, 4  ;;  %s13_s26 = int_to_ptr.vmem [resolvable:$true] %s12_s26  ;;  %s17_s29 = int_to_ptr.vmem [resolvable:$true] %s16_s29 }
   0x2   :  { %s698_s30 = scalar_lea.vmem %s13_s26, 32  ;;  %p703_p1 = scmp.lt.s32.totalorder %s13_s26, %s13_s26 }
   0x3   :  { %p699_p0 = scmp.ne.s32.totalorder %s13_s26, %s698_s30  ;;  %p704_p2 = scmp.lt.s32.totalorder %s698_s30, %s698_s30 }
   0x5   :  { %p705_p3 = por %p704_p2, %p703_p1 }
   0x7   :  { %p706_p4 = pnand %p705_p3, %p699_p0 }
   0x9   :  { %709 = shalt.err (!%p706_p4)  }
   0xa   :  { %s824_s8 = smov [#allocation6]   ;;  %s710_s9 = scalar_lea.vmem %s17_s29, 32 }
   0xb   :  { %15 = dma.vmem_to_smem %s13_s26, 32, %s824_s8, [#allocation5] }
   0xc   :  { %p711_p5 = scmp.ne.s32.totalorder %s17_s29, %s710_s9  ;;  %p715_p6 = scmp.lt.s32.totalorder %s17_s29, %s17_s29 }
   0xd   :  { %p716_p7 = scmp.lt.s32.totalorder %s710_s9, %s710_s9 }
   0xf   :  { %p717_p8 = por %p716_p7, %p715_p6 }
  0x11   :  { %p718_p9 = pnand %p717_p8, %p711_p5 }
  0x13   :  { %721 = shalt.err (!%p718_p9)  }
  0x14   :  { %s825_s0 = smov [#allocation7]  }
  0x15   :  { %19 = dma.vmem_to_smem %s17_s29, 32, %s825_s0, [#allocation5] }
  0x16   :  { %782 = dma.done.wait [#allocation5], 64 }
  0x17   :  { %783 = vsyncadd [#allocation5], 4294967232 }
  0x18   :  { %21 = sfence }
  0x19   :  { %22 = vsyncpa [#allocation9], 0 }
  0x1a   :  { %24 = vsyncpa [#allocation9 + $0x1], 0  ;;  %s873_s1 = smov 0   ;;  %s875_s10 = smov 0  }
  0x1b   :  { %s877_s11 = smov 0   ;;  %s879_s12 = smov 0  }
  0x1c   :  { %s881_s13 = smov 0   ;;  %s883_s14 = smov 0  }
  0x1d LB: > { %1021 = sst [smem:[#allocation16_spill]] %s810_s13  ;;  %s594_s15 = sadd.s32 4294967295, %s814_s14   ;;  %s814_s14 = sphi %s883_s14, %s30_s14   ;;  %s810_s13 = sphi %s881_s13, %s1031_s13   ;;  %s806_s12 = sphi %s879_s12, %s1030_s12   ;;  %s802_s11 = sphi %s877_s11, %s1034_s11   ;;  %s798_s10 = sphi %s875_s10, %s1033_s10   ;;  %s794_s1 = sphi %s873_s1, %s1032_s1  }
  0x1e   : > { %s595_s16 = sadd.s32 4294967294, %s814_s14   ;;  %s42_s17 = sadd.s32 1, %s810_s13 }
  0x1f   : > { %s119_s18 = sadd.s32 1, %s802_s11  ;;  %p44_p10 = scmp.ge.s32.totalorder %s42_s17, 2 }
  0x20   : > { %p129_p11 = scmp.ne.s32.totalorder %s802_s11, %s798_s10  ;;  %p130_p12 = scmp.eq.s32.totalorder %s594_s15, 1 }
  0x21   : > { %p135_p13 = scmp.ne.s32.totalorder %s798_s10, %s794_s1  ;;  %s1036_s17 = smov (%p44_p10, %s42_s17), 0 }
  0x22   : > { %1022 = sst [smem:[#allocation17_spill]] %s1036_s17  ;;  %p913_p0 = por %p130_p12, %p129_p11 }
  0x23   : > { %p136_p1 = scmp.eq.s32.totalorder %s595_s16, 1  ;;  %s114_s20 = ssub.s32 %s810_s13, %s1036_s17 }
  0x24   : > { %p598_p2 = scmp.ge.s32.totalorder %s814_s14, 1  ;;  %p117_p3 = scmp.eq.s32.totalorder %s114_s20, 0 }
  0x25   : > { %p920_p4 = por %p136_p1, %p135_p13  ;;  %p167_p5 = scmp.lt.s32.totalorder %s814_s14, 3 }
  0x26   : > { %s926_s22 = scalar_select %p117_p3, %s802_s11, %s119_s18  }
  0x27   : > { %p168_p6 = pnand %p598_p2, %p167_p5 }
  0x28   : > { %1025 = sst [smem:[#allocation18_spill]] %s926_s22  ;;  %s1018_s23 = sand.u32 (!%p168_p6), 1, %s798_s10  }
  0x29   : > { %171 = sbr.rel (%p168_p6) target bundleno = 412 (0x19c), region = 32  ;;  %s931_s24 = sshll.u32 (!%p168_p6), %s1018_s23, 3 }
  0x2a   : > { %s816_s26 = smov (!%p168_p6), 0  }
  0x30 LB: >> { %s202_s27 = sshra.s32 %s818_s26, 7  ;;  %s207_s28 = sand.u32 127, %s818_s26  ;;  %s818_s26 = sphi %s816_s26, %s200_s26  }
  0x31   : >> { %s204_s29 = sadd.s32 %s806_s12, %s202_s27  ;;  %s212_s20 = scalar_lea.vmem [#allocation2], %s818_s26 }
  0x32   : >> { %s600_s30 = sshll.u32 %s204_s29, 7  ;;  %s213_s23 = scalar_lea.sflag [#allocation4], %s818_s26 }
  0x33   : >> { %s208_s8 = sadd.s32 %s600_s30, %s207_s28 }
  0x34   : >> { %s209_s9 = sld [smem:[#allocation6 + %s208_s8]] }
  0x35   : >> { %s210_s0 = sld [smem:[#allocation7 + %s208_s8]] }
  0x3a   : >> { %s211_s18 = scalar_lea.vmem %s1011_s2, %s209_s9 }
  0x3b   : >> { %v231_v0 = vld [vmem:[%s211_s18] sm:$0x1] }
  0x3c   : >> { %232 = vst [vmem:[%s212_s20] sm:$0x1] %v231_v0 }
  0x3d   : >> { %257 = vsyncadd %s213_s23, 16  ;;  %s258_s13 = scalar_lea.vmem %s1012_s3, %s210_s0  ;;  %s521_s22 = scalar_lea.sflag %s213_s23, 8 [#allocation4] }
  0x3e   : >> { %v279_v1 = vld [vmem:[%s258_s13] sm:$0x1]  ;;  %s259_s27 = scalar_lea.vmem [#allocation3], %s818_s26 }
  0x3f   : >> { %280 = vst [vmem:[%s259_s27] sm:$0x1] %v279_v1 }
  0x40   : >> { %305 = vsyncadd %s521_s22, 16  ;;  %s200_s26 = sadd.s32 1, %s818_s26  }
  0x41   : >> { %p197_p7 = scmp.ge.s32.totalorder %s200_s26, 8  }
  0x42   : > { %s820_s28 = smov (%p197_p7), 0  }
  0x43   : > { %199 = sbr.rel (!%p197_p7) target bundleno = 48 (0x30), region = 184 }
  0x4a LB: >> { %s312_s29 = scalar_lea.sflag [#allocation4], %s822_s28  ;;  %s822_s28 = sphi %s820_s28, %s311_s28  }
  0x4b   : >> { %784 = dma.done.wait %s312_s29, 16 }
  0x4c   : >> { %785 = vsyncadd %s312_s29, 4294967280  ;;  %s526_s30 = scalar_lea.sflag %s312_s29, 8 [#allocation4] }
  0x4d   : >> { %786 = dma.done.wait %s526_s30, 16 }
  0x4e   : >> { %787 = vsyncadd %s526_s30, 4294967280  ;;  %s311_s28 = sadd.s32 1, %s822_s28  }
  0x4f   : >> { %p308_p8 = scmp.ge.s32.totalorder %s311_s28, 8  }
  0x50   : > { %v320_v2 = vld [vmem:[#allocation2] sm:$0xff] (%p308_p8)  ;;  %v321_v3 = vld [vmem:[#allocation3] sm:$0xff] (%p308_p8)  ;;  %vm325_vm0 = vcmask (%p308_p8), 261120   ;;  %s604_s8 = sshll.u32 (%p308_p8), %s806_s12, 7  ;;  %s1026_s9 = scalar_lea.vmem (%p308_p8), [#allocation8], %s931_s24 }
  0x51   : > { %310 = sbr.rel (!%p308_p8) target bundleno = 74 (0x4a), region = 195  ;;  %v323_v4 = vld [vmem:[%s1013_s4] sm:$0xff] (%p308_p8)  ;;  %v322_v5 = vadd.f32 (%p308_p8), %v321_v3, %v320_v2  ;;  %s372_s0 = sshll.u32 (%p308_p8), %s1026_s9, 4  ;;  %s960_s0 = int_to_ptr.vmem [resolvable:$true] %s372_s0 }
  0x52   : > { %v601_v17 = vld [vmem:[%s1014_s5] ss:$0 sm:$0xff] (%p308_p8)  ;;  %s958_s18 = scalar_lea.hbm (%p308_p8), %s1016_s7, %s604_s8  ;;  %s1027_s20 = smov (%p308_p8), %s1026_s9 }
  0x53   : > { %v324_v6 = vadd.f32 (%p308_p8), %v323_v4, %v322_v5  ;;  %v602_v19 = vld [vmem:[%s1015_s6] ss:$0 sm:$0xff] (%p308_p8)  ;;  %s1028_s27 = sand.u32 (%p308_p8), 1, %s798_s10   ;;  %s722_s12 = scalar_lea.vmem (%p308_p8), %s960_s0, 128 }
  0x54   : > { %s358_s28 = scalar_lea.sflag (%p308_p8), [#allocation9], %s1028_s27  ;;  %p723_p9 = scmp.ne.s32.totalorder (%p308_p8), %s960_s0, %s722_s12 }
  0x55   : > { %v326_v7 = vsel (%p308_p8), %vm325_vm0, %v324_v6, 0.0  ;;  %s826_s29 = smov (%p308_p8), [#allocation8]  }
  0x56   : > { %327 = vadd.xlane.f32.xlu0 (%p308_p8), %v326_v7  ;;  %p724_p10 = pnand (%p308_p8), %p723_p9, %p913_p0  ;;  %s726_s30 = sshll.u32 (%p308_p8), %s826_s29, 4  ;;  %s727_s30 = int_to_ptr.vmem [resolvable:$false] %s726_s30 }
  0x57   : > { %s728_s13 = scalar_lea.vmem (%p308_p8), %s727_s30, 256  ;;  %p729_p12 = scmp.lt.s32.totalorder (%p308_p8), %s960_s0, %s727_s30 }
  0x58   : > { %p725_p11 = pneg %p724_p10  ;;  %p730_p13 = scmp.lt.s32.totalorder %s728_s13, %s722_s12 }
  0x5a   : > { %p731_p1 = por %p730_p13, %p729_p12 }
  0x5c   : > { %p732_p2 = pnand %p731_p1, %p725_p11 }
  0xe3   : > { %v328_v8 = vpop.xlane.xlu0 %327 }
  0xe4   : > { %v330_v9 = vmul.f32 0.03125, %v328_v8 }
  0xe6   : > { %v331_v10 = vsub.f32 %v324_v6, %v330_v9 }
  0xe8   : > { %v332_v11 = vmul.f32 %v331_v10, %v331_v10 }
  0xea   : > { %v333_v12 = vsel %vm325_vm0, %v332_v11, 0.0 }
  0xeb   : > { %334 = vadd.xlane.f32.xlu0 %v333_v12 }
 0x178   : > { %v335_v13 = vpop.xlane.xlu0 %334 }
 0x179   : > { %v336_v14 = vmul.f32 0.03125, %v335_v13 }
 0x17b   : > { %v337_v15 = vadd.f32 1e-12, %v336_v14 }
 0x17d   : > { %696 = vrsqrt.f32 %v337_v15 }
 0x187   : > { %v697_v16 = vpop.eup %696 }
 0x188   : > { %v339_v18 = vmul.f32 %v697_v16, %v331_v10 }
 0x18a   : > { %v347_v20 = vmul.f32 %v601_v17, %v339_v18 }
 0x18c   : > { %v355_v21 = vadd.f32 %v602_v19, %v347_v20 }
 0x18e   : > { %356 = vst.msk [vmem:[%s1027_s20] sm:$0xff] %vm325_vm0, %v355_v21 }
 0x18f   : > { %735 = shalt.err (!%p732_p2)
}
 0x190   : > { %s736_s24 = scalar_lea.hbm %s958_s18, 128  ;;  %s740_s23 = scalar_lea.hbm %s1016_s7, 256 }
 0x191   : > { %p737_p3 = scmp.ne.s32.totalorder %s958_s18, %s736_s24  ;;  %p741_p7 = scmp.lt.u32.totalorder %s958_s18, %s1016_s7 }
 0x192   : > { %p742_p8 = scmp.lt.u32.totalorder %s740_s23, %s736_s24  ;;  %p744_p10 = scmp.lt.u32.totalorder %s736_s24, %s958_s18 }
 0x193   : > { %p738_p5 = pnand %p737_p3, %p913_p0 }
 0x194   : > { %p743_p9 = por %p742_p8, %p741_p7 }
 0x195   : > { %p739_p6 = pneg %p738_p5 }
 0x196   : > { %p745_p11 = por %p744_p10, %p743_p9 }
 0x198   : > { %p746_p12 = pnand %p745_p11, %p739_p6 }
 0x19a   : > { %749 = shalt.err (!%p746_p12)
}
 0x19b   : > { %623 = dma.vmem_to_hbm [thread:$0]  (%p913_p0), %s960_s0, 128, %s958_s18, %s358_s28  }
 0x19c PF: > { %p629_p13 = scmp.ge.s32.totalorder %s814_s14, 2  ;;  %s384_s8 = sand.u32 1, %s794_s1  }
 0x19d   : > { %s385_s9 = scalar_lea.sflag [#allocation9], %s384_s8 }
 0x19e   : > { %p626_p1 = pnand %p629_p13, %p920_p4 }
 0x1a0   : > { %789 = dma.done.wait (!%p626_p1), %s385_s9, 128  }
 0x1a1   : > { %791 = vsyncadd (!%p626_p1), %s385_s9, 4294967168  ;;  %s30_s14 = sadd.s32 1, %s814_s14   ;;  %s1029_s19 = sld [smem:[#allocation18_spill]] }
 0x1a2   : > { %p27_p2 = scmp.ge.s32.totalorder %s30_s14, 4   ;;  %s1030_s12 = sld [smem:[#allocation16_spill]] }
 0x1a3   : > { %s1031_s13 = sld [smem:[#allocation17_spill]]  ;;  %s1032_s1 = smov %s798_s10 }
 0x1a4   : > { %s1033_s10 = smov %s802_s11  ;;  %29 = sbr.rel (!%p27_p2) target bundleno = 29 (0x1d), region = 206 }
 0x1a7   : > { %s1034_s11 = smov %s1029_s19 }
 0x1ab   :  { %390 = vsyncpa [#allocation9], 1 }
 0x1ac   :  { %392 = vsyncpa [#allocation9 + $0x1], 1 }
 0x1ad   :  { %393 = vsyncmov [#allocation4] }
 0x1b0   :  { %s394_s21 = vpop.sfrf %393 }
 0x1b1   :  { %p607_p0 = scmp.ne.s32.totalorder %s394_s21, 0 }
 0x1b3   :  { %398 = shalt.err (%p607_p0)  }
 0x1b4   :  { %400 = vsyncmov [#allocation4 + $0x1] }
 0x1b7   :  { %s401_s0 = vpop.sfrf %400 }
 0x1b8   :  { %p608_p4 = scmp.ne.s32.totalorder %s401_s0, 0 }
 0x1ba   :  { %405 = shalt.err (%p608_p4)  }
 0x1bb   :  { %407 = vsyncmov [#allocation4 + $0x2] }
 0x1be   :  { %s408_s15 = vpop.sfrf %407 }
 0x1bf   :  { %p609_p3 = scmp.ne.s32.totalorder %s408_s15, 0 }
 0x1c1   :  { %412 = shalt.err (%p609_p3)  }
 0x1c2   :  { %414 = vsyncmov [#allocation4 + $0x3] }
 0x1c5   :  { %s415_s16 = vpop.sfrf %414 }
 0x1c6   :  { %p610_p5 = scmp.ne.s32.totalorder %s415_s16, 0 }
 0x1c8   :  { %419 = shalt.err (%p610_p5)  }
 0x1c9   :  { %421 = vsyncmov [#allocation4 + $0x4] }
 0x1cc   :  { %s422_s14 = vpop.sfrf %421 }
 0x1cd   :  { %p611_p6 = scmp.ne.s32.totalorder %s422_s14, 0 }
 0x1cf   :  { %426 = shalt.err (%p611_p6)  }
 0x1d0   :  { %428 = vsyncmov [#allocation4 + $0x5] }
 0x1d3   :  { %s429_s2 = vpop.sfrf %428 }
 0x1d4   :  { %p612_p7 = scmp.ne.s32.totalorder %s429_s2, 0 }
 0x1d6   :  { %433 = shalt.err (%p612_p7)  }
 0x1d7   :  { %435 = vsyncmov [#allocation4 + $0x6] }
 0x1da   :  { %s436_s3 = vpop.sfrf %435 }
 0x1db   :  { %p613_p8 = scmp.ne.s32.totalorder %s436_s3, 0 }
 0x1dd   :  { %440 = shalt.err (%p613_p8)  }
 0x1de   :  { %442 = vsyncmov [#allocation4 + $0x7] }
 0x1e1   :  { %s443_s4 = vpop.sfrf %442 }
 0x1e2   :  { %p614_p9 = scmp.ne.s32.totalorder %s443_s4, 0 }
 0x1e4   :  { %447 = shalt.err (%p614_p9)  }
 0x1e5   :  { %449 = vsyncmov [#allocation4 + $0x8] }
 0x1e8   :  { %s450_s5 = vpop.sfrf %449 }
 0x1e9   :  { %p615_p10 = scmp.ne.s32.totalorder %s450_s5, 0 }
 0x1eb   :  { %454 = shalt.err (%p615_p10)  }
 0x1ec   :  { %456 = vsyncmov [#allocation4 + $0x9] }
 0x1ef   :  { %s457_s6 = vpop.sfrf %456 }
 0x1f0   :  { %p616_p11 = scmp.ne.s32.totalorder %s457_s6, 0 }
 0x1f2   :  { %461 = shalt.err (%p616_p11)  }
 0x1f3   :  { %463 = vsyncmov [#allocation4 + $0xa] }
 0x1f6   :  { %s464_s7 = vpop.sfrf %463 }
 0x1f7   :  { %p617_p12 = scmp.ne.s32.totalorder %s464_s7, 0 }
 0x1f9   :  { %468 = shalt.err (%p617_p12)  }
 0x1fa   :  { %470 = vsyncmov [#allocation4 + $0xb] }
 0x1fd   :  { %s471_s1 = vpop.sfrf %470 }
 0x1fe   :  { %p618_p13 = scmp.ne.s32.totalorder %s471_s1, 0 }
 0x200   :  { %475 = shalt.err (%p618_p13)  }
 0x201   :  { %477 = vsyncmov [#allocation4 + $0xc] }
 0x204   :  { %s478_s10 = vpop.sfrf %477 }
 0x205   :  { %p619_p1 = scmp.ne.s32.totalorder %s478_s10, 0 }
 0x207   :  { %482 = shalt.err (%p619_p1)  }
 0x208   :  { %484 = vsyncmov [#allocation4 + $0xd] }
 0x20b   :  { %s485_s11 = vpop.sfrf %484 }
 0x20c   :  { %p620_p2 = scmp.ne.s32.totalorder %s485_s11, 0 }
 0x20e   :  { %489 = shalt.err (%p620_p2)  }
 0x20f   :  { %491 = vsyncmov [#allocation4 + $0xe] }
 0x212   :  { %s492_s18 = vpop.sfrf %491 }
 0x213   :  { %p621_p0 = scmp.ne.s32.totalorder %s492_s18, 0 }
 0x215   :  { %496 = shalt.err (%p621_p0)  }
 0x216   :  { %498 = vsyncmov [#allocation4 + $0xf] }
 0x219   :  { %s499_s20 = vpop.sfrf %498 }
 0x21a   :  { %p622_p4 = scmp.ne.s32.totalorder %s499_s20, 0 }
 0x21c   :  { %503 = shalt.err (%p622_p4)  }

</bundles_post_ra>
